<compile_context>
chip_gen: v6e
topology: v6e:2x2x1
jax: 0.10.0
libtpu: 0.0.40
codegen_flags: <defaults>
</compile_context>

<pallas_src>
import math

import jax
import jax.numpy as jnp
from jax.experimental import pallas as pl
from jax.experimental.pallas import tpu as pltpu

# ---------------- model dimensions (small, consistent with the forward) ------
B = 2            # batch
S = 8            # sequence length
BS = B * S       # flattened tokens
V = 16           # vocab size
D_MODEL = 24     # token-embedding dim (Embeddings.d_model)
D_POS = 8        # positional-embedding dim
D = D_MODEL + D_POS   # hidden dim = 32
H = 2            # attention heads
DH = D // H      # head dim = 16
FF = 64          # FFN inner dim
C = 4            # number of output classes
MAX_POS = 32     # positional table size
NV = V + MAX_POS # combined (token | position) table rows = 48
LN_EPS = 1e-5
NEG_INF = -1e9

# ---------------- packed-operand layout ---------------------------------------
LANES = 128
# weight-slab row offsets (all multiples of 8 -> no tile-boundary crossings)
TAB_R0 = 0                  # table   (NV, D)     cols 0:D
WQKV_R0 = TAB_R0 + NV       # 48      (D, 3D)     cols 0:3D
WO_R0 = WQKV_R0 + D         # 80      (D, D)      cols 0:D
W1_R0 = WO_R0 + D           # 112     (D, FF)     cols 0:FF
W2_R0 = W1_R0 + D           # 144     (FF, D)     cols 0:D
WC_R0 = W2_R0 + FF          # 208     (D, 128)    cols 0:C used, rest zero (lane-dense out)
SP_R0 = WC_R0 + D           # 240     (8, 128)    b1 | b2 | ln1_g | ln1_b | ln2_g | ln2_b | bc_pad
SLAB_ROWS = SP_R0 + 8       # 248
# packed int32 input block: (BS, IDX_COLS); col0 = src, col1 = pos+V,
# cols KEEP_C0 : KEEP_C0+BS = (same-batch AND key-unmasked) keep flags
KEEP_C0 = 8
IDX_COLS = KEEP_C0 + BS     # 24


# ---------------------------- fused Pallas kernel -----------------------------
def model_kernel(idx_ref, w_ref, out_ref, attn_ref):
    """Embedding lookup + 1 transformer encoder layer + classifier, one invocation."""
    f32 = jnp.float32

    src = idx_ref[:, 0:1]                           # (BS, 1) token ids
    posv = idx_ref[:, 1:2]                          # (BS, 1) position ids + V
    keep = idx_ref[:, KEEP_C0:KEEP_C0 + BS]         # (BS, BS) combined keep flags

    # ---- Embeddings.forward (+ positional lookup): exact "two-hot" one-shot MXU
    #      matmul against the packed block-diagonal table.  NOTE: out-of-range ids
    #      map to a zero embedding (nn.Embedding would raise); inputs validated upstream.
    col = jax.lax.broadcasted_iota(jnp.int32, (BS, NV), 1)
    two_hot = (col == src).astype(f32) + (col == posv).astype(f32)        # (BS, NV)
    x = jnp.dot(two_hot, w_ref[TAB_R0:TAB_R0 + NV, :D],
                preferred_element_type=f32)                               # (BS, D)
    # dropout: eval mode => identity

    # ---- packed small parameters (single row block of the slab) ----------------
    sp = w_ref[SP_R0:SP_R0 + 8, :]
    b1 = sp[0:1, :FF]
    b2 = sp[1:2, :D]
    g1 = sp[2:3, :D]
    be1 = sp[3:4, :D]
    g2 = sp[4:5, :D]
    be2 = sp[5:6, :D]
    bc = sp[6:7, :]                                  # (1, 128), zero beyond C

    # ---- additive attention bias: host-combined block-diag & key-mask -> one select
    bias = jnp.where(keep > 0, 0.0, NEG_INF).astype(f32)                  # (BS, BS)

    # ---- multi-head self-attention over the flattened (BS, BS) score matrix ----
    qkv = jnp.dot(x, w_ref[WQKV_R0:WQKV_R0 + D, :3 * D],
                  preferred_element_type=f32)                             # (BS, 3D)
    q = qkv[:, :D] * (1.0 / math.sqrt(DH))           # pre-scaled once
    k = qkv[:, D:2 * D]
    v = qkv[:, 2 * D:]
    wo = w_ref[WO_R0:WO_R0 + D, :D]

    attn_out = jnp.zeros((BS, D), f32)
    for h in range(H):                               # H=2, unrolled
        qh = q[:, h * DH:(h + 1) * DH]
        kh = k[:, h * DH:(h + 1) * DH]
        vh = v[:, h * DH:(h + 1) * DH]
        # q @ k^T via dot_general contracting dim 1 of both (no explicit transpose)
        s = jax.lax.dot_general(qh, kh, (((1,), (1,)), ((), ())),
                                preferred_element_type=f32) + bias        # (BS, BS)
        m = jnp.max(s, axis=-1, keepdims=True)
        e = jnp.exp(s - m)
        p = e / jnp.sum(e, axis=-1, keepdims=True)   # exact softmax
        attn_ref[h] = p                              # one contiguous store per head
        ctx = jnp.dot(p, vh, preferred_element_type=f32)                  # (BS, DH)
        attn_out = attn_out + jnp.dot(ctx, wo[h * DH:(h + 1) * DH, :],
                                      preferred_element_type=f32)

    # ---- residual + LayerNorm 1 -------------------------------------------------
    h1 = x + attn_out
    mu1 = jnp.mean(h1, axis=-1, keepdims=True)
    var1 = jnp.mean((h1 - mu1) ** 2, axis=-1, keepdims=True)
    h1n = (h1 - mu1) * jax.lax.rsqrt(var1 + LN_EPS) * g1 + be1

    # ---- position-wise FFN --------------------------------------------------------
    f = jnp.dot(h1n, w_ref[W1_R0:W1_R0 + D, :FF], preferred_element_type=f32) + b1
    f = jnp.maximum(f, 0.0)
    f = jnp.dot(f, w_ref[W2_R0:W2_R0 + FF, :D], preferred_element_type=f32) + b2

    # ---- residual + LayerNorm 2 -> memory (never leaves VMEM/vregs) --------------
    h2 = h1n + f
    mu2 = jnp.mean(h2, axis=-1, keepdims=True)
    var2 = jnp.mean((h2 - mu2) ** 2, axis=-1, keepdims=True)
    mem = (h2 - mu2) * jax.lax.rsqrt(var2 + LN_EPS) * g2 + be2

    # ---- classifier head: zero-padded Wc -> lane-dense (BS, 128) store ------------
    out_ref[...] = jnp.dot(mem, w_ref[WC_R0:WC_R0 + D, :],
                           preferred_element_type=f32) + bc


# ---------------------------- wrapper ------------------------------------------
_VMEM_SPEC = pl.BlockSpec(memory_space=pltpu.MemorySpace.VMEM)


@jax.jit
def model_forward(src, pos_ind, src_mask, w_slab):
    """Mirrors Model.forward(src, pos_ind, src_mask) -> (out, attn)."""
    srcc = src.reshape(BS, 1).astype(jnp.int32)
    posc = pos_ind.reshape(BS, 1).astype(jnp.int32) + V     # pos + V pre-added on host
    # static same-batch block-diagonal combined with the runtime key mask (tiny XLA)
    bid = jnp.arange(BS, dtype=jnp.int32) // S
    keep = jnp.logical_and(bid[:, None] == bid[None, :],
                           src_mask.reshape(1, BS) > 0).astype(jnp.int32)  # (BS, BS)
    idx = jnp.concatenate(
        [srcc, posc, jnp.zeros((BS, KEEP_C0 - 2), jnp.int32), keep], axis=1)  # (BS, 24)

    out_pad, attn_full = pl.pallas_call(
        model_kernel,
        in_specs=[_VMEM_SPEC, _VMEM_SPEC],
        out_specs=(_VMEM_SPEC, _VMEM_SPEC),
        out_shape=(jax.ShapeDtypeStruct((BS, LANES), jnp.float32),
                   jax.ShapeDtypeStruct((H, BS, BS), jnp.float32)),
    )(idx, w_slab)

    out = out_pad[:, :C].reshape(B, S, C)                    # slice lane-dense output
    attn = jnp.stack(                                        # diagonal blocks -> (B,H,S,S)
        [attn_full[:, b * S:(b + 1) * S, b * S:(b + 1) * S] for b in range(B)], axis=0)
    return out, attn


# ---------------------------- parameters ----------------------------------------
def init_params(key):
    ks = jax.random.split(key, 16)
    u = lambda k, shape, s: jax.random.normal(k, shape, jnp.float32) * s
    return {
        "embed":   u(ks[0], (V, D_MODEL), 0.1),        # Embeddings.lut weight (emb)
        "pos_emb": u(ks[1], (MAX_POS, D_POS), 0.1),
        "wq": u(ks[2], (D, D), 1.0 / math.sqrt(D)),
        "wk": u(ks[3], (D, D), 1.0 / math.sqrt(D)),
        "wv": u(ks[4], (D, D), 1.0 / math.sqrt(D)),
        "wo": u(ks[5], (D, D), 1.0 / math.sqrt(D)),
        "w1": u(ks[6], (D, FF), 1.0 / math.sqrt(D)),
        "b1": jnp.zeros((1, FF), jnp.float32),
        "w2": u(ks[7], (FF, D), 1.0 / math.sqrt(FF)),
        "b2": jnp.zeros((1, D), jnp.float32),
        "ln1_g": jnp.ones((1, D), jnp.float32),
        "ln1_b": jnp.zeros((1, D), jnp.float32),
        "ln2_g": jnp.ones((1, D), jnp.float32),
        "ln2_b": jnp.zeros((1, D), jnp.float32),
        "wc": u(ks[8], (D, C), 1.0 / math.sqrt(D)),
        "bc": jnp.zeros((1, C), jnp.float32),
    }


def pack_params(p):
    """One-time packing of ALL static parameters into a single lane-dense slab."""
    slab = jnp.zeros((SLAB_ROWS, LANES), jnp.float32)
    slab = slab.at[TAB_R0:TAB_R0 + V, :D_MODEL].set(p["embed"])
    slab = slab.at[TAB_R0 + V:TAB_R0 + NV, D_MODEL:D].set(p["pos_emb"])
    wqkv = jnp.concatenate([p["wq"], p["wk"], p["wv"]], axis=1)
    slab = slab.at[WQKV_R0:WQKV_R0 + D, :3 * D].set(wqkv)
    slab = slab.at[WO_R0:WO_R0 + D, :D].set(p["wo"])
    slab = slab.at[W1_R0:W1_R0 + D, :FF].set(p["w1"])
    slab = slab.at[W2_R0:W2_R0 + FF, :D].set(p["w2"])
    slab = slab.at[WC_R0:WC_R0 + D, :C].set(p["wc"])       # zero-padded to 128 lanes
    slab = slab.at[SP_R0 + 0, :FF].set(p["b1"][0])
    slab = slab.at[SP_R0 + 1, :D].set(p["b2"][0])
    slab = slab.at[SP_R0 + 2, :D].set(p["ln1_g"][0])
    slab = slab.at[SP_R0 + 3, :D].set(p["ln1_b"][0])
    slab = slab.at[SP_R0 + 4, :D].set(p["ln2_g"][0])
    slab = slab.at[SP_R0 + 5, :D].set(p["ln2_b"][0])
    slab = slab.at[SP_R0 + 6, :C].set(p["bc"][0])
    return slab


# ---------------------------- pure-JAX reference ---------------------------------
def _ln(x, g, b):
    mu = jnp.mean(x, axis=-1, keepdims=True)
    var = jnp.mean((x - mu) ** 2, axis=-1, keepdims=True)
    return (x - mu) * jax.lax.rsqrt(var + LN_EPS) * g + b


def reference_forward(src, pos_ind, src_mask, p):
    x = jnp.concatenate([p["embed"][src], p["pos_emb"][pos_ind]],
                        axis=-1).astype(jnp.float32)                     # (B,S,D)
    q = (x @ p["wq"]).reshape(B, S, H, DH).transpose(0, 2, 1, 3)
    k = (x @ p["wk"]).reshape(B, S, H, DH).transpose(0, 2, 1, 3)
    v = (x @ p["wv"]).reshape(B, S, H, DH).transpose(0, 2, 1, 3)
    scores = jnp.einsum("bhqd,bhkd->bhqk", q, k) / math.sqrt(DH)
    maskb = (src_mask > 0)[:, None, None, :]
    scores = jnp.where(maskb, scores, NEG_INF)
    attn = jax.nn.softmax(scores, axis=-1)
    ctx = jnp.einsum("bhqk,bhkd->bhqd", attn, v).transpose(0, 2, 1, 3).reshape(B, S, D)
    h1n = _ln(x + ctx @ p["wo"], p["ln1_g"], p["ln1_b"])
    f = jnp.maximum(h1n @ p["w1"] + p["b1"], 0.0) @ p["w2"] + p["b2"]
    mem = _ln(h1n + f, p["ln2_g"], p["ln2_b"])
    out = mem @ p["wc"] + p["bc"]
    return out, attn


# ---------------------------- main ------------------------------------------------
if __name__ == "__main__":
    key = jax.random.PRNGKey(0)
    kp, k1 = jax.random.split(key, 2)
    params = init_params(kp)
    w_slab = pack_params(params)

    src = jax.random.randint(k1, (B, S), 0, V, dtype=jnp.int32)
    pos_ind = jnp.tile(jnp.arange(S, dtype=jnp.int32)[None, :], (B, 1))
    # last two tokens of batch 1 padded out
    src_mask = jnp.array([[1] * S, [1] * (S - 2) + [0, 0]], dtype=jnp.int32)

    out, attn = model_forward(src, pos_ind, src_mask, w_slab)
    out = jax.block_until_ready(out)
    attn = jax.block_until_ready(attn)

    ref_out, ref_attn = reference_forward(src, pos_ind, src_mask, params)

    assert out.shape == (B, S, C) and attn.shape == (B, H, S, S)
    assert bool(jnp.all(jnp.isfinite(out))) and bool(jnp.all(jnp.isfinite(attn)))
    # exact softmax -> rows sum to 1 to f32 precision
    assert bool(jnp.allclose(jnp.sum(attn, axis=-1), 1.0, atol=1e-5))
    # match the pure-JAX reference
    assert bool(jnp.allclose(out, ref_out, rtol=1e-4, atol=1e-4))
    assert bool(jnp.allclose(attn, ref_attn, rtol=1e-4, atol=1e-4))
    print("KERNEL_OK")
</pallas_src>

<mosaic_0001>
module attributes {stable_mosaic.version = 11 : i64} {
  func.func @model_kernel(%arg0: memref<16x24xi32, #tpu.memory_space<vmem>>, %arg1: memref<248x128xf32, #tpu.memory_space<vmem>>, %arg2: memref<16x128xf32, #tpu.memory_space<vmem>>, %arg3: memref<2x16x16xf32, #tpu.memory_space<vmem>>) attributes {dimension_semantics = [], scalar_prefetch = 0 : i64, scratch_operands = 0 : i64, tpu.core_type = #tpu.core_type<tc>} {
    %c0 = arith.constant 0 : index
    %c0_0 = arith.constant 0 : index
    %0 = vector.load %arg0[%c0, %c0_0] : memref<16x24xi32, #tpu.memory_space<vmem>>, vector<16x1xi32>
    %c0_1 = arith.constant 0 : index
    %c1 = arith.constant 1 : index
    %1 = vector.load %arg0[%c0_1, %c1] : memref<16x24xi32, #tpu.memory_space<vmem>>, vector<16x1xi32>
    %c0_2 = arith.constant 0 : index
    %c8 = arith.constant 8 : index
    %2 = vector.load %arg0[%c0_2, %c8] : memref<16x24xi32, #tpu.memory_space<vmem>>, vector<16x16xi32>
    %3 = tpu.iota {dimensions = array<i32: 1>} : vector<16x48xi32>
    %4 = vector.broadcast %0 : vector<16x1xi32> to vector<16x48xi32>
    %5 = arith.cmpi eq, %3, %4 : vector<16x48xi32>
    %6 = arith.extui %5 : vector<16x48xi1> to vector<16x48xi32>
    %7 = arith.sitofp %6 : vector<16x48xi32> to vector<16x48xf32>
    %8 = vector.broadcast %1 : vector<16x1xi32> to vector<16x48xi32>
    %9 = arith.cmpi eq, %3, %8 : vector<16x48xi32>
    %10 = arith.extui %9 : vector<16x48xi1> to vector<16x48xi32>
    %11 = arith.sitofp %10 : vector<16x48xi32> to vector<16x48xf32>
    %12 = arith.addf %7, %11 : vector<16x48xf32>
    %c0_3 = arith.constant 0 : index
    %c0_4 = arith.constant 0 : index
    %13 = vector.load %arg1[%c0_3, %c0_4] : memref<248x128xf32, #tpu.memory_space<vmem>>, vector<48x32xf32>
    %cst = arith.constant dense<0.000000e+00> : vector<16x32xf32>
    %14 = tpu.matmul %12, %13, %cst {dimension_numbers = #tpu.dot_dimension_numbers<[1], [0], [0], [1], [0, 0, 1, 1], [], []>} : vector<16x48xf32>, vector<48x32xf32>, vector<16x32xf32> -> vector<16x32xf32>
    %c240 = arith.constant 240 : index
    %c0_5 = arith.constant 0 : index
    %15 = vector.load %arg1[%c240, %c0_5] : memref<248x128xf32, #tpu.memory_space<vmem>>, vector<8x128xf32>
    %16 = vector.extract_strided_slice %15 {offsets = [0, 0], sizes = [1, 64], strides = [1, 1]} : vector<8x128xf32> to vector<1x64xf32>
    %17 = vector.extract_strided_slice %15 {offsets = [1, 0], sizes = [1, 32], strides = [1, 1]} : vector<8x128xf32> to vector<1x32xf32>
    %18 = vector.extract_strided_slice %15 {offsets = [2, 0], sizes = [1, 32], strides = [1, 1]} : vector<8x128xf32> to vector<1x32xf32>
    %19 = vector.extract_strided_slice %15 {offsets = [3, 0], sizes = [1, 32], strides = [1, 1]} : vector<8x128xf32> to vector<1x32xf32>
    %20 = vector.extract_strided_slice %15 {offsets = [4, 0], sizes = [1, 32], strides = [1, 1]} : vector<8x128xf32> to vector<1x32xf32>
    %21 = vector.extract_strided_slice %15 {offsets = [5, 0], sizes = [1, 32], strides = [1, 1]} : vector<8x128xf32> to vector<1x32xf32>
    %22 = vector.extract_strided_slice %15 {offsets = [6, 0], sizes = [1, 128], strides = [1, 1]} : vector<8x128xf32> to vector<1x128xf32>
    %c0_i32 = arith.constant 0 : i32
    %23 = vector.broadcast %c0_i32 : i32 to vector<16x16xi32>
    %24 = arith.cmpi sgt, %2, %23 : vector<16x16xi32>
    %cst_6 = arith.constant 0.000000e+00 : f32
    %cst_7 = arith.constant -1.000000e+09 : f32
    %25 = vector.broadcast %cst_6 : f32 to vector<16x16xf32>
    %26 = vector.broadcast %cst_7 : f32 to vector<16x16xf32>
    %27 = arith.select %24, %25, %26 : vector<16x16xi1>, vector<16x16xf32>
    %c48 = arith.constant 48 : index
    %c0_8 = arith.constant 0 : index
    %28 = vector.load %arg1[%c48, %c0_8] : memref<248x128xf32, #tpu.memory_space<vmem>>, vector<32x96xf32>
    %cst_9 = arith.constant dense<0.000000e+00> : vector<16x96xf32>
    %29 = tpu.matmul %14, %28, %cst_9 {dimension_numbers = #tpu.dot_dimension_numbers<[1], [0], [0], [1], [0, 0, 1, 1], [], []>} : vector<16x32xf32>, vector<32x96xf32>, vector<16x96xf32> -> vector<16x96xf32>
    %30 = vector.extract_strided_slice %29 {offsets = [0, 0], sizes = [16, 32], strides = [1, 1]} : vector<16x96xf32> to vector<16x32xf32>
    %cst_10 = arith.constant 2.500000e-01 : f32
    %31 = vector.broadcast %cst_10 : f32 to vector<16x32xf32>
    %32 = arith.mulf %30, %31 : vector<16x32xf32>
    %33 = vector.extract_strided_slice %29 {offsets = [0, 32], sizes = [16, 32], strides = [1, 1]} : vector<16x96xf32> to vector<16x32xf32>
    %34 = vector.extract_strided_slice %29 {offsets = [0, 64], sizes = [16, 32], strides = [1, 1]} : vector<16x96xf32> to vector<16x32xf32>
    %c80 = arith.constant 80 : index
    %c0_11 = arith.constant 0 : index
    %35 = vector.load %arg1[%c80, %c0_11] : memref<248x128xf32, #tpu.memory_space<vmem>>, vector<32x32xf32>
    %cst_12 = arith.constant 0.000000e+00 : f32
    %36 = vector.broadcast %cst_12 : f32 to vector<16x32xf32>
    %37 = vector.extract_strided_slice %32 {offsets = [0, 0], sizes = [16, 16], strides = [1, 1]} : vector<16x32xf32> to vector<16x16xf32>
    %38 = vector.extract_strided_slice %33 {offsets = [0, 0], sizes = [16, 16], strides = [1, 1]} : vector<16x32xf32> to vector<16x16xf32>
    %39 = vector.extract_strided_slice %34 {offsets = [0, 0], sizes = [16, 16], strides = [1, 1]} : vector<16x32xf32> to vector<16x16xf32>
    %cst_13 = arith.constant dense<0.000000e+00> : vector<16x16xf32>
    %40 = tpu.matmul %37, %38, %cst_13 {dimension_numbers = #tpu.dot_dimension_numbers<[1], [1], [0], [0], [0, 0, 1, 0], [], []>} : vector<16x16xf32>, vector<16x16xf32>, vector<16x16xf32> -> vector<16x16xf32>
    %41 = arith.addf %40, %27 : vector<16x16xf32>
    %cst_14 = arith.constant dense<0xFF800000> : vector<16xf32>
    %42 = vector.multi_reduction <maximumf>, %41, %cst_14 [1] : vector<16x16xf32> to vector<16xf32>
    %43 = vector.shape_cast %42 : vector<16xf32> to vector<16x1xf32>
    %44 = vector.broadcast %43 : vector<16x1xf32> to vector<16x16xf32>
    %45 = arith.subf %41, %44 : vector<16x16xf32>
    %46 = math.exp %45 : vector<16x16xf32>
    %cst_15 = arith.constant dense<0.000000e+00> : vector<16xf32>
    %47 = vector.multi_reduction <add>, %46, %cst_15 [1] : vector<16x16xf32> to vector<16xf32>
    %48 = vector.shape_cast %47 : vector<16xf32> to vector<16x1xf32>
    %49 = vector.broadcast %48 : vector<16x1xf32> to vector<16x16xf32>
    %50 = arith.divf %46, %49 : vector<16x16xf32>
    %c0_16 = arith.constant 0 : index
    %c0_17 = arith.constant 0 : index
    %c0_18 = arith.constant 0 : index
    %51 = vector.load %arg3[%c0_16, %c0_17, %c0_18] : memref<2x16x16xf32, #tpu.memory_space<vmem>>, vector<1x16x16xf32>
    %52 = vector.shape_cast %51 : vector<1x16x16xf32> to vector<16x16xf32>
    %53 = vector.shape_cast %50 : vector<16x16xf32> to vector<1x16x16xf32>
    tpu.vector_store %arg3[%c0_16, %c0_17, %c0_18], %53 {strides = array<i32>} : memref<2x16x16xf32, #tpu.memory_space<vmem>>, vector<1x16x16xf32>,
    %cst_19 = arith.constant dense<0.000000e+00> : vector<16x16xf32>
    %54 = tpu.matmul %50, %39, %cst_19 {dimension_numbers = #tpu.dot_dimension_numbers<[1], [0], [0], [1], [0, 0, 1, 1], [], []>} : vector<16x16xf32>, vector<16x16xf32>, vector<16x16xf32> -> vector<16x16xf32>
    %55 = vector.extract_strided_slice %35 {offsets = [0, 0], sizes = [16, 32], strides = [1, 1]} : vector<32x32xf32> to vector<16x32xf32>
    %cst_20 = arith.constant dense<0.000000e+00> : vector<16x32xf32>
    %56 = tpu.matmul %54, %55, %cst_20 {dimension_numbers = #tpu.dot_dimension_numbers<[1], [0], [0], [1], [0, 0, 1, 1], [], []>} : vector<16x16xf32>, vector<16x32xf32>, vector<16x32xf32> -> vector<16x32xf32>
    %57 = arith.addf %36, %56 : vector<16x32xf32>
    %58 = vector.extract_strided_slice %32 {offsets = [0, 16], sizes = [16, 16], strides = [1, 1]} : vector<16x32xf32> to vector<16x16xf32>
    %59 = vector.extract_strided_slice %33 {offsets = [0, 16], sizes = [16, 16], strides = [1, 1]} : vector<16x32xf32> to vector<16x16xf32>
    %60 = vector.extract_strided_slice %34 {offsets = [0, 16], sizes = [16, 16], strides = [1, 1]} : vector<16x32xf32> to vector<16x16xf32>
    %cst_21 = arith.constant dense<0.000000e+00> : vector<16x16xf32>
    %61 = tpu.matmul %58, %59, %cst_21 {dimension_numbers = #tpu.dot_dimension_numbers<[1], [1], [0], [0], [0, 0, 1, 0], [], []>} : vector<16x16xf32>, vector<16x16xf32>, vector<16x16xf32> -> vector<16x16xf32>
    %62 = arith.addf %61, %27 : vector<16x16xf32>
    %cst_22 = arith.constant dense<0xFF800000> : vector<16xf32>
    %63 = vector.multi_reduction <maximumf>, %62, %cst_22 [1] : vector<16x16xf32> to vector<16xf32>
    %64 = vector.shape_cast %63 : vector<16xf32> to vector<16x1xf32>
    %65 = vector.broadcast %64 : vector<16x1xf32> to vector<16x16xf32>
    %66 = arith.subf %62, %65 : vector<16x16xf32>
    %67 = math.exp %66 : vector<16x16xf32>
    %cst_23 = arith.constant dense<0.000000e+00> : vector<16xf32>
    %68 = vector.multi_reduction <add>, %67, %cst_23 [1] : vector<16x16xf32> to vector<16xf32>
    %69 = vector.shape_cast %68 : vector<16xf32> to vector<16x1xf32>
    %70 = vector.broadcast %69 : vector<16x1xf32> to vector<16x16xf32>
    %71 = arith.divf %67, %70 : vector<16x16xf32>
    %c1_24 = arith.constant 1 : index
    %c0_25 = arith.constant 0 : index
    %c0_26 = arith.constant 0 : index
    %72 = vector.load %arg3[%c1_24, %c0_25, %c0_26] : memref<2x16x16xf32, #tpu.memory_space<vmem>>, vector<1x16x16xf32>
    %73 = vector.shape_cast %72 : vector<1x16x16xf32> to vector<16x16xf32>
    %74 = vector.shape_cast %71 : vector<16x16xf32> to vector<1x16x16xf32>
    tpu.vector_store %arg3[%c1_24, %c0_25, %c0_26], %74 {strides = array<i32>} : memref<2x16x16xf32, #tpu.memory_space<vmem>>, vector<1x16x16xf32>,
    %cst_27 = arith.constant dense<0.000000e+00> : vector<16x16xf32>
    %75 = tpu.matmul %71, %60, %cst_27 {dimension_numbers = #tpu.dot_dimension_numbers<[1], [0], [0], [1], [0, 0, 1, 1], [], []>} : vector<16x16xf32>, vector<16x16xf32>, vector<16x16xf32> -> vector<16x16xf32>
    %76 = vector.extract_strided_slice %35 {offsets = [16, 0], sizes = [16, 32], strides = [1, 1]} : vector<32x32xf32> to vector<16x32xf32>
    %cst_28 = arith.constant dense<0.000000e+00> : vector<16x32xf32>
    %77 = tpu.matmul %75, %76, %cst_28 {dimension_numbers = #tpu.dot_dimension_numbers<[1], [0], [0], [1], [0, 0, 1, 1], [], []>} : vector<16x16xf32>, vector<16x32xf32>, vector<16x32xf32> -> vector<16x32xf32>
    %78 = arith.addf %57, %77 : vector<16x32xf32>
    %79 = arith.addf %14, %78 : vector<16x32xf32>
    %cst_29 = arith.constant dense<0.000000e+00> : vector<16xf32>
    %80 = vector.multi_reduction <add>, %79, %cst_29 [1] : vector<16x32xf32> to vector<16xf32>
    %81 = vector.shape_cast %80 : vector<16xf32> to vector<16x1xf32>
    %cst_30 = arith.constant 3.200000e+01 : f32
    %82 = vector.broadcast %cst_30 : f32 to vector<16x1xf32>
    %83 = arith.divf %81, %82 : vector<16x1xf32>
    %84 = vector.broadcast %83 : vector<16x1xf32> to vector<16x32xf32>
    %85 = arith.subf %79, %84 : vector<16x32xf32>
    %86 = arith.mulf %85, %85 : vector<16x32xf32>
    %cst_31 = arith.constant dense<0.000000e+00> : vector<16xf32>
    %87 = vector.multi_reduction <add>, %86, %cst_31 [1] : vector<16x32xf32> to vector<16xf32>
    %88 = vector.shape_cast %87 : vector<16xf32> to vector<16x1xf32>
    %cst_32 = arith.constant 3.200000e+01 : f32
    %89 = vector.broadcast %cst_32 : f32 to vector<16x1xf32>
    %90 = arith.divf %88, %89 : vector<16x1xf32>
    %91 = vector.broadcast %83 : vector<16x1xf32> to vector<16x32xf32>
    %92 = arith.subf %79, %91 : vector<16x32xf32>
    %cst_33 = arith.constant 9.99999974E-6 : f32
    %93 = vector.broadcast %cst_33 : f32 to vector<16x1xf32>
    %94 = arith.addf %90, %93 : vector<16x1xf32>
    %95 = math.rsqrt %94 : vector<16x1xf32>
    %96 = vector.broadcast %95 : vector<16x1xf32> to vector<16x32xf32>
    %97 = arith.mulf %92, %96 : vector<16x32xf32>
    %98 = vector.broadcast %18 : vector<1x32xf32> to vector<16x32xf32>
    %99 = arith.mulf %97, %98 : vector<16x32xf32>
    %100 = vector.broadcast %19 : vector<1x32xf32> to vector<16x32xf32>
    %101 = arith.addf %99, %100 : vector<16x32xf32>
    %c112 = arith.constant 112 : index
    %c0_34 = arith.constant 0 : index
    %102 = vector.load %arg1[%c112, %c0_34] : memref<248x128xf32, #tpu.memory_space<vmem>>, vector<32x64xf32>
    %cst_35 = arith.constant dense<0.000000e+00> : vector<16x64xf32>
    %103 = tpu.matmul %101, %102, %cst_35 {dimension_numbers = #tpu.dot_dimension_numbers<[1], [0], [0], [1], [0, 0, 1, 1], [], []>} : vector<16x32xf32>, vector<32x64xf32>, vector<16x64xf32> -> vector<16x64xf32>
    %104 = vector.broadcast %16 : vector<1x64xf32> to vector<16x64xf32>
    %105 = arith.addf %103, %104 : vector<16x64xf32>
    %cst_36 = arith.constant 0.000000e+00 : f32
    %106 = vector.broadcast %cst_36 : f32 to vector<16x64xf32>
    %107 = arith.maximumf %105, %106 : vector<16x64xf32>
    %c144 = arith.constant 144 : index
    %c0_37 = arith.constant 0 : index
    %108 = vector.load %arg1[%c144, %c0_37] : memref<248x128xf32, #tpu.memory_space<vmem>>, vector<64x32xf32>
    %cst_38 = arith.constant dense<0.000000e+00> : vector<16x32xf32>
    %109 = tpu.matmul %107, %108, %cst_38 {dimension_numbers = #tpu.dot_dimension_numbers<[1], [0], [0], [1], [0, 0, 1, 1], [], []>} : vector<16x64xf32>, vector<64x32xf32>, vector<16x32xf32> -> vector<16x32xf32>
    %110 = vector.broadcast %17 : vector<1x32xf32> to vector<16x32xf32>
    %111 = arith.addf %109, %110 : vector<16x32xf32>
    %112 = arith.addf %101, %111 : vector<16x32xf32>
    %cst_39 = arith.constant dense<0.000000e+00> : vector<16xf32>
    %113 = vector.multi_reduction <add>, %112, %cst_39 [1] : vector<16x32xf32> to vector<16xf32>
    %114 = vector.shape_cast %113 : vector<16xf32> to vector<16x1xf32>
    %cst_40 = arith.constant 3.200000e+01 : f32
    %115 = vector.broadcast %cst_40 : f32 to vector<16x1xf32>
    %116 = arith.divf %114, %115 : vector<16x1xf32>
    %117 = vector.broadcast %116 : vector<16x1xf32> to vector<16x32xf32>
    %118 = arith.subf %112, %117 : vector<16x32xf32>
    %119 = arith.mulf %118, %118 : vector<16x32xf32>
    %cst_41 = arith.constant dense<0.000000e+00> : vector<16xf32>
    %120 = vector.multi_reduction <add>, %119, %cst_41 [1] : vector<16x32xf32> to vector<16xf32>
    %121 = vector.shape_cast %120 : vector<16xf32> to vector<16x1xf32>
    %cst_42 = arith.constant 3.200000e+01 : f32
    %122 = vector.broadcast %cst_42 : f32 to vector<16x1xf32>
    %123 = arith.divf %121, %122 : vector<16x1xf32>
    %124 = vector.broadcast %116 : vector<16x1xf32> to vector<16x32xf32>
    %125 = arith.subf %112, %124 : vector<16x32xf32>
    %cst_43 = arith.constant 9.99999974E-6 : f32
    %126 = vector.broadcast %cst_43 : f32 to vector<16x1xf32>
    %127 = arith.addf %123, %126 : vector<16x1xf32>
    %128 = math.rsqrt %127 : vector<16x1xf32>
    %129 = vector.broadcast %128 : vector<16x1xf32> to vector<16x32xf32>
    %130 = arith.mulf %125, %129 : vector<16x32xf32>
    %131 = vector.broadcast %20 : vector<1x32xf32> to vector<16x32xf32>
    %132 = arith.mulf %130, %131 : vector<16x32xf32>
    %133 = vector.broadcast %21 : vector<1x32xf32> to vector<16x32xf32>
    %134 = arith.addf %132, %133 : vector<16x32xf32>
    %c208 = arith.constant 208 : index
    %c0_44 = arith.constant 0 : index
    %135 = vector.load %arg1[%c208, %c0_44] : memref<248x128xf32, #tpu.memory_space<vmem>>, vector<32x128xf32>
    %cst_45 = arith.constant dense<0.000000e+00> : vector<16x128xf32>
    %136 = tpu.matmul %134, %135, %cst_45 {dimension_numbers = #tpu.dot_dimension_numbers<[1], [0], [0], [1], [0, 0, 1, 1], [], []>} : vector<16x32xf32>, vector<32x128xf32>, vector<16x128xf32> -> vector<16x128xf32>
    %137 = vector.broadcast %22 : vector<1x128xf32> to vector<16x128xf32>
    %138 = arith.addf %136, %137 : vector<16x128xf32>
    %c0_46 = arith.constant 0 : index
    %c0_47 = arith.constant 0 : index
    %139 = vector.load %arg2[%c0_46, %c0_47] : memref<16x128xf32, #tpu.memory_space<vmem>>, vector<16x128xf32>
    tpu.vector_store %arg2[%c0_46, %c0_47], %138 {strides = array<i32>} : memref<16x128xf32, #tpu.memory_space<vmem>>, vector<16x128xf32>,
    return
  }
}

</mosaic_0001>

<bundles_post_ra>
// kernel: model_forward.1
= control target key start
LH: loop header
LB: loop body
LE: loop exit
PB: predicated region body
PF: predicated region fallthrough
CT: control target
= control target key end

     0   :  { %9 = vsyncpa [#allocation3], 0  ;;  %s1448_s12 = smov [#allocation2]   ;;  %s1614_s0 = inlined_call_operand.vmem [shape: s32[16,24], index: 0, kind: input, shape index: {}]   ;;  %s1615_s1 = inlined_call_operand.hbm [shape: f32[248,128], index: 1, kind: input, shape index: {}]   ;;  %s1616_s2 = inlined_call_operand.vmem [shape: f32[16,128], index: 2, kind: output, shape index: {0}]   ;;  %s1617_s3 = inlined_call_operand.vmem [shape: f32[2,16,16], index: 3, kind: output, shape index: {1}]  }
   0x1   :  { %s17_s13 = sshll.u32 %s1448_s12, 4  ;;  %s18_s13 = int_to_ptr.vmem [resolvable:$true] %s17_s13 }
   0x2   :  { %s1434_s14 = scalar_lea.vmem %s18_s13, 3968  ;;  %p1439_p1 = scmp.lt.s32.totalorder %s18_s13, %s18_s13 }
   0x3   :  { %p1435_p0 = scmp.ne.s32.totalorder %s18_s13, %s1434_s14  ;;  %p1440_p2 = scmp.lt.s32.totalorder %s1434_s14, %s1434_s14 }
   0x5   :  { %p1441_p3 = por %p1440_p2, %p1439_p1 }
   0x7   :  { %p1442_p4 = pnand %p1441_p3, %p1435_p0 }
   0x9   :  { %1445 = shalt.err (!%p1442_p4)
}
   0xa   :  { %s1449_s15 = smov 128   ;;  %s1450_s16 = smov 8  }
   0xb   :  { %23 = dma.hbm_to_vmem [thread:$0]  %s1615_s1, 3968, %s18_s13, [#allocation3], %s1449_s15, %s1449_s15, %s1450_s16  }
   0xc   :  { %1446 = dma.done.wait [#allocation3], 3968  }
   0xd   :  { %1447 = vsyncadd [#allocation3], 4294963328  ;;  %v1451_v0 = vmov 0   ;;  %v1487_v1 = vld [vmem:[%s1614_s0 + $0x8] sm:$0xff]  ;;  %v1492_v2 = vld [vmem:[%s1614_s0] sm:$0xff]  ;;  %v1452_v5 = vmov 1   ;;  %v29_v12 = vlaneseq }
   0xe   :  { %1400 = vset.pattern.permute.xlu1 %v1451_v0  ;;  %1398 = vset.pattern.permute.xlu0 %v1451_v0  ;;  %v62_v3 = vld [vmem:[#allocation2 + $0x28] sm:$0xff]  ;;  %v61_v4 = vld [vmem:[#allocation2 + $0x20] sm:$0xff]  ;;  %v60_v6 = vld [vmem:[#allocation2 + $0x18] sm:$0xff]  ;;  %vm63_vm4 = vcmask 392192   ;;  %v1453_v18 = vmov 0.0   ;;  %vm154_vm5 = vcmask 261120  }
   0xf   :  { %35 = vperm.xlu1 %1400, %v1487_v1   ;;  %32 = vperm.xlu0 %1398, %v1492_v2   ;;  %v59_v7 = vld [vmem:[#allocation2 + $0x10] sm:$0xff]  ;;  %v153_v8 = vld [vmem:[#allocation2 + $0x48] sm:$0xff]  ;;  %v152_v9 = vld [vmem:[#allocation2 + $0x40] sm:$0xff]  ;;  %v30_v13 = vand.u32 127, %v29_v12  ;;  %vm146_vm6 = vcmp.gt.s32.totalorder %v1492_v2, 0  ;;  %s1454_s0 = smov 96  }
  0x10   :  { %1276 = vmatprep.subr.mxu0 %v62_v3  ;;  %1291 = vmatprep.subr.mxu1 %v153_v8  ;;  %v58_v10 = vld [vmem:[#allocation2 + $0x8] sm:$0xff]  ;;  %v57_v11 = vld [vmem:[#allocation2] sm:$0xff]  ;;  %v151_v25 = vld [vmem:[#allocation2 + $0x38] sm:$0xff]  ;;  %vm147_vm7 = vcmp.gt.s32.totalorder %v1487_v1, 0  ;;  %vm256_vm8 = vcmask 130048   ;;  %s1456_s1 = smov 120  }
  0x11   :  { %1277 = vmatpush3.msra.mxu0 %v62_v3  ;;  %1292 = vmatpush3.msra.mxu1 %v153_v8  ;;  %v150_v26 = vld [vmem:[#allocation2 + $0x30] sm:$0xff]  ;;  %v1455_v31 = vmov -1e+09   ;;  %s1457_s23 = smov 64   ;;  %s1458_s24 = smov 80   ;;  %vm962_vm9 = vcmask 523264  }
  0x12   :  { %1278 = vmatprep.subr.mxu0 %v61_v4  ;;  %1293 = vmatprep.subr.mxu1 %v152_v9  ;;  %v148_v32 = vsel %vm146_vm6, 0.0, %v1455_v31  ;;  %v149_v34 = vsel %vm147_vm7, 0.0, %v1455_v31  ;;  %s1459_s25 = smov 112   ;;  %s1460_s30 = smov 48  }
  0x13   :  { %1401 = vset.pattern.permute.xlu1 %v1452_v5  ;;  %1399 = vset.pattern.permute.xlu0 %v1452_v5  ;;  %v238_v5 = vld [vmem:[#allocation2 + $0x50] sm:$0xff] }
  0x14   :  { %47 = vperm.xlu1 %1401, %v1487_v1   ;;  %44 = vperm.xlu0 %1399, %v1492_v2  }
  0x15   :  { %1279 = vmatpush3.msra.mxu0 %v61_v4  ;;  %1294 = vmatpush3.msra.mxu1 %v152_v9  ;;  %v239_v4 = vld [vmem:[#allocation2 + $0x58] sm:$0xff] }
  0x16   :  { %1280 = vmatprep.subr.mxu0 %v60_v6  ;;  %1295 = vmatprep.subr.mxu1 %v151_v25 }
  0x17   :  { %1281 = vmatpush3.msra.mxu0 %v60_v6  ;;  %1296 = vmatpush3.msra.mxu1 %v151_v25 }
  0x18   :  { %1282 = vmatprep.subr.mxu0 %v59_v7  ;;  %1297 = vmatprep.subr.mxu1 %v150_v26 }
  0x19   :  { %1283 = vmatpush3.msra.mxu0 %v59_v7  ;;  %1298 = vmatpush3.msra.mxu1 %v150_v26 }
  0x1a   :  { %1284 = vmatprep.subr.mxu0 %v58_v10 }
  0x1b   :  { %1285 = vmatpush3.msra.mxu0 %v58_v10 }
  0x1c   :  { %1286 = vmatprep.subr.mxu0 %v57_v11 }
  0x1d   :  { %1287 = vmatpush3.msra.mxu0 %v57_v11 }
  0x8a   :  { %v33_v14 = vpop.permute.xlu0 %32  ;;  %v36_v15 = vpop.permute.xlu1 %35 }
  0x8b   :  { %vm37_vm0 = vcmp.eq.s32.totalorder %v30_v13, %v33_v14  ;;  %vm38_vm1 = vcmp.eq.s32.totalorder %v30_v13, %v36_v15 }
  0x8c   :  { %v1184_v19 = vsel %vm37_vm0, 1.0, %v1453_v18  ;;  %v1185_v20 = vsel %vm38_vm1, 1.0, %v1453_v18 }
  0x8f   :  { %v48_v16 = vpop.permute.xlu1 %47  ;;  %v45_v17 = vpop.permute.xlu0 %44 }
  0x90   :  { %vm50_vm2 = vcmp.eq.s32.totalorder %v30_v13, %v48_v16  ;;  %vm49_vm3 = vcmp.eq.s32.totalorder %v30_v13, %v45_v17 }
  0x91   :  { %v1187_v21 = vsel %vm50_vm2, 1.0, %v1453_v18  ;;  %v1186_v22 = vsel %vm49_vm3, 1.0, %v1453_v18 }
  0x92   :  { %v56_v23 = vadd.f32 %v1187_v21, %v1185_v20  ;;  %v55_v24 = vadd.f32 %v1186_v22, %v1184_v19 }
  0x94   :  { %1288 = vmatprep.mubr.msk.f32.mxu0 %vm63_vm4, %v55_v24 }
  0x95   :  { %1289 = vmatmul.mubr.msk.f32.vlgmr.msra.gmra.mxu0 %vm63_vm4, %v56_v23 }
 0x155   :  { %v1499_v27 = vpop.f32.mrf.mxu0 }
 0x157   :  { %v1501_v28 = vpop.f32.mrf.mxu0 }
 0x158   :  { %1299 = vmatprep.mubr.msk.f32.mxu1 %vm154_vm5, %v1501_v28 }
 0x159   :  { %1300 = vmatmul.mubr.msk.f32.vlgmr.msra.gmra.mxu1 %vm154_vm5, %v1499_v27 }
 0x219   :  { %v1508_v29 = vpop.f32.mrf.mxu1 }
 0x21a   :  { %246 = vrot.lane.b32.xlu1 %v1508_v29, %s1454_s0  ;;  %v237_v37 = vmul.f32 0.25, %v1508_v29 }
 0x21b   :  { %v1512_v30 = vpop.f32.mrf.mxu1 }
 0x21c   :  { %244 = vrot.lane.b32.xlu0 %v1512_v30, %s1454_s0  ;;  %v236_v33 = vmul.f32 0.25, %v1512_v30 }
 0x21e   :  { %1306 = vmatprep.mubr.msk.f32.mxu1 %vm256_vm8, %v236_v33  ;;  %250 = vrot.lane.b32.xlu1 %v148_v32, %s1456_s1 }
 0x220   :  { %252 = vrot.lane.b32.xlu0 %v149_v34, %s1456_s1 }
 0x28c   :  { %v247_v35 = vpop.permute.xlu1 %246 }
 0x28d   :  { %1302 = vmatprep.subr.msk.mxu1 %vm256_vm8, %v247_v35 }
 0x28e   :  { %1303 = vmatpush3.xpose.msk.msra.mxu1 %vm256_vm8, %v247_v35  ;;  %v245_v36 = vpop.permute.xlu0 %244 }
 0x28f   :  { %1304 = vmatprep.subr.msk.mxu1 %vm256_vm8, %v245_v36 }
 0x290   :  { %v1525_v40 = vpop.permute.xlu1 %250 }
 0x292   :  { %1305 = vmatpush3.xpose.msk.msra.mxu1 %vm256_vm8, %v245_v36  ;;  %v1523_v38 = vpop.permute.xlu0 %252 }
 0x295   :  { %1307 = vmatmul.mubr.msk.f32.vlgmr.msra.gmra.mxu1 %vm256_vm8, %v237_v37 }
 0x355   :  { %v1308_v39 = vpop.f32.mrf.mxu1 }
 0x356   :  { %v339_v41 = vadd.f32 %v1308_v39, %v1523_v38 }
 0x357   :  { %v333_v42 = vpop.f32.mrf.mxu1 }
 0x358   :  { %v334_v43 = vadd.f32 %v333_v42, %v1525_v40  ;;  %v345_v44 = vsel %vm256_vm8, %v339_v41, -inf }
 0x359   :  { %346 = vmax.xlane.f32.xlu0 %v345_v44 }
 0x35a   :  { %v342_v45 = vsel %vm256_vm8, %v334_v43, -inf }
 0x35b   :  { %343 = vmax.xlane.f32.xlu1 %v342_v45 }
 0x3e2   :  { %v347_v46 = vpop.xlane.xlu0 %346 }
 0x3e3   :  { %v349_v47 = vsub.f32 %v339_v41, %v347_v46 }
 0x3e4   :  { %v344_v48 = vpop.xlane.xlu1 %343 }
 0x3e5   :  { %v352_v49 = vmul.f32 1.442695, %v349_v47  ;;  %v348_v50 = vsub.f32 %v334_v43, %v344_v48 }
 0x3e7   :  { %1402 = vpow2.f32 %v352_v49  ;;  %v350_v51 = vmul.f32 1.442695, %v348_v50 }
 0x3e9   :  { %1404 = vpow2.f32 %v350_v51 }
 0x3f4   :  { %v1403_v52 = vpop.eup %1402 }
 0x3f5   :  { %v357_v53 = vsel %vm256_vm8, %v1403_v52, 0.0 }
 0x3f6   :  { %v1405_v54 = vpop.eup %1404  ;;  %358 = vadd.xlane.f32.xlu1 %v357_v53 }
 0x3f7   :  { %v354_v55 = vsel %vm256_vm8, %v1405_v54, 0.0 }
 0x3f8   :  { %355 = vadd.xlane.f32.xlu0 %v354_v55 }
 0x407   :  { %366 = vrot.lane.b32.xlu1 %v1512_v30, %s1457_s23 }
 0x40b   :  { %459 = vrot.lane.b32.xlu1 %v1508_v29, %s1458_s24 }
 0x40e   :  { %368 = vrot.lane.b32.xlu0 %v1508_v29, %s1457_s23 }
 0x40f   :  { %453 = vrot.lane.b32.xlu1 %v236_v33, %s1459_s25  ;;  %v241_v33 = vld [vmem:[#allocation2 + $0x68] sm:$0xff] }
 0x412   :  { %457 = vrot.lane.b32.xlu0 %v1512_v30, %s1458_s24 }
 0x416   :  { %455 = vrot.lane.b32.xlu0 %v237_v37, %s1459_s25 }
 0x47f   :  { %v359_v56 = vpop.xlane.xlu1 %358 }
 0x480   :  { %1406 = vrcp.f32 %v359_v56 }
 0x481   :  { %v356_v57 = vpop.xlane.xlu0 %355 }
 0x482   :  { %1408 = vrcp.f32 %v356_v57 }
 0x483   :  { %v367_v58 = vpop.permute.xlu1 %366 }
 0x485   :  { %v369_v59 = vpop.permute.xlu0 %368 }
 0x486   :  { %1309 = vmatprep.subr.mxu0 %v369_v59 }
 0x487   :  { %1310 = vmatpush3.msra.mxu0 %v369_v59  ;;  %v460_v60 = vpop.permute.xlu1 %459  ;;  %v860_v59 = vld [vmem:[#allocation2 + $0x78] sm:$0xff] }
 0x488   :  { %1311 = vmatprep.subr.mxu0 %v367_v58 }
 0x489   :  { %1312 = vmatpush3.msra.mxu0 %v367_v58  ;;  %v458_v2 = vpop.permute.xlu0 %457  ;;  %v862_v58 = vld [vmem:[#allocation2 + $0x88] sm:$0xff] }
 0x48a   :  { %1316 = vmatprep.subr.msk.mxu0 %vm256_vm8, %v460_v60 }
 0x48b   :  { %v454_v1 = vpop.permute.xlu1 %453 }
 0x48d   :  { %v1407_v61 = vpop.eup %1406  ;;  %v456_v3 = vpop.permute.xlu0 %455 }
 0x48e   :  { %v363_v62 = vmul.f32 %v1407_v61, %v1403_v52  ;;  %v957_v61 = vld [vmem:[#allocation2 + $0xc8] sm:$0xff] }
 0x48f   :  { %v1409_v63 = vpop.eup %1408 }
 0x490   :  { %v361_v0 = vmul.f32 %v1409_v63, %v1405_v54  ;;  %365 = vst.msk [vmem:[%s1617_s3 + $0x8] sm:$0xff] %vm256_vm8, %v363_v62  ;;  %v955_v63 = vld [vmem:[#allocation2 + $0xb8] sm:$0xff] }
 0x492   :  { %364 = vst.msk [vmem:[%s1617_s3] sm:$0xff] %vm256_vm8, %v361_v0  ;;  %1313 = vmatprep.mubr.msk.f32.mxu0 %vm256_vm8, %v361_v0  ;;  %v954_v0 = vld [vmem:[#allocation2 + $0xb0] sm:$0xff] }
 0x493   :  { %1314 = vmatmul.mubr.msk.f32.vlgmr.msra.gmra.mxu0 %vm256_vm8, %v363_v62  ;;  %v956_v62 = vld [vmem:[#allocation2 + $0xc0] sm:$0xff] }
 0x494   :  { %1317 = vmatpush3.xpose.msk.msra.mxu0 %vm256_vm8, %v460_v60  ;;  %1320 = vmatprep.mubr.msk.f32.mxu0 %vm256_vm8, %v454_v1  ;;  %v859_v60 = vld [vmem:[#allocation2 + $0x70] sm:$0xff] }
 0x495   :  { %1318 = vmatprep.subr.msk.mxu0 %vm256_vm8, %v458_v2 }
 0x498   :  { %1319 = vmatpush3.xpose.msk.msra.mxu0 %vm256_vm8, %v458_v2 }
 0x499   :  { %1337 = vmatprep.subr.mxu0 %v239_v4 }
 0x49b   :  { %1321 = vmatmul.mubr.msk.f32.vlgmr.msra.gmra.mxu0 %vm256_vm8, %v456_v3 }
 0x49c   :  { %1338 = vmatpush3.msra.mxu0 %v239_v4 }
 0x49d   :  { %1339 = vmatprep.subr.mxu0 %v238_v5 }
 0x49e   :  { %1340 = vmatpush3.msra.mxu0 %v238_v5 }
 0x49f   :  { %1355 = vmatprep.subr.mxu0 %v957_v61 }
 0x553   :  { %v1315_v6 = vpop.f32.mrf.mxu0 }
 0x555   :  { %v444_v7 = vpop.f32.mrf.mxu0 }
 0x556   :  { %1341 = vmatprep.mubr.msk.f32.mxu0 %vm256_vm8, %v444_v7  ;;  %v1582_v7 = vshrl.u32 %v29_v12, 7  ;;  %v953_v12 = vld [vmem:[#allocation2 + $0xa8] sm:$0xff] }
 0x557   :  { %1342 = vmatmul.mubr.msk.f32.vlgmr.msra.gmra.mxu0 %vm256_vm8, %v1315_v6 }
 0x558   :  { %1356 = vmatpush3.msra.mxu0 %v957_v61 }
 0x559   :  { %1357 = vmatprep.subr.mxu0 %v956_v62 }
 0x55a   :  { %1358 = vmatpush3.msra.mxu0 %v956_v62 }
 0x55b   :  { %v1322_v8 = vpop.f32.mrf.mxu0  ;;  %1359 = vmatprep.subr.mxu0 %v955_v63 }
 0x55c   :  { %v541_v9 = vadd.f32 %v1322_v8, %v1523_v38  ;;  %1360 = vmatpush3.msra.mxu0 %v955_v63  ;;  %v849_v8 = vsub.s32 2, %v1582_v7  ;;  %v1074_v63 = vsub.s32 4, %v1582_v7 }
 0x55d   :  { %v535_v10 = vpop.f32.mrf.mxu0  ;;  %1361 = vmatprep.subr.mxu0 %v954_v0 }
 0x55e   :  { %v536_v11 = vadd.f32 %v535_v10, %v1525_v40  ;;  %v547_v13 = vsel %vm256_vm8, %v541_v9, -inf  ;;  %1362 = vmatpush3.msra.mxu0 %v954_v0 }
 0x55f   :  { %548 = vmax.xlane.f32.xlu0 %v547_v13  ;;  %v855_v13 = vsub.s32 3, %v1582_v7  ;;  %1363 = vmatprep.subr.mxu0 %v953_v12 }
 0x560   :  { %v544_v14 = vsel %vm256_vm8, %v536_v11, -inf  ;;  %1364 = vmatpush3.msra.mxu0 %v953_v12 }
 0x561   :  { %545 = vmax.xlane.f32.xlu1 %v544_v14 }
 0x5e8   :  { %v549_v15 = vpop.xlane.xlu0 %548 }
 0x5e9   :  { %v551_v16 = vsub.f32 %v541_v9, %v549_v15  ;;  %v1585_v9 = vld [vmem:[#allocation2 + $0xf0] sm:$0xff] }
 0x5ea   :  { %v546_v17 = vpop.xlane.xlu1 %545 }
 0x5eb   :  { %v554_v18 = vmul.f32 1.442695, %v551_v16  ;;  %v550_v19 = vsub.f32 %v536_v11, %v546_v17  ;;  %v850_v11 = vrot.slane %v1585_v9, %v849_v8 }
 0x5ed   :  { %1410 = vpow2.f32 %v554_v18  ;;  %v552_v20 = vmul.f32 1.442695, %v550_v19  ;;  %v856_v18 = vrot.slane %v1585_v9, %v855_v13 }
 0x5ef   :  { %1412 = vpow2.f32 %v552_v20 }
 0x5fa   :  { %v1411_v21 = vpop.eup %1410 }
 0x5fb   :  { %v559_v22 = vsel %vm256_vm8, %v1411_v21, 0.0 }
 0x5fc   :  { %v1413_v23 = vpop.eup %1412  ;;  %560 = vadd.xlane.f32.xlu1 %v559_v22  ;;  %v952_v22 = vld [vmem:[#allocation2 + $0xa0] sm:$0xff] }
 0x5fd   :  { %v556_v24 = vsel %vm256_vm8, %v1413_v23, 0.0  ;;  %1365 = vmatprep.subr.mxu0 %v952_v22 }
 0x5fe   :  { %557 = vadd.xlane.f32.xlu0 %v556_v24  ;;  %1366 = vmatpush3.msra.mxu0 %v952_v22  ;;  %v950_v24 = vld [vmem:[#allocation2 + $0x90] sm:$0xff] }
 0x60d   :  { %569 = vrot.lane.b32.xlu1 %v1512_v30, %s1460_s30 }
 0x614   :  { %571 = vrot.lane.b32.xlu0 %v1508_v29, %s1460_s30  ;;  %v240_v29 = vld [vmem:[#allocation2 + $0x60] sm:$0xff] }
 0x617   :  { %v1343_v39 = vpop.f32.mrf.mxu0 }
 0x619   :  { %v809_v42 = vpop.f32.mrf.mxu0 }
 0x685   :  { %v561_v25 = vpop.xlane.xlu1 %560 }
 0x686   :  { %1414 = vrcp.f32 %v561_v25  ;;  %v865_v25 = vsub.s32 0, %v1582_v7 }
 0x687   :  { %v558_v26 = vpop.xlane.xlu0 %557 }
 0x688   :  { %1416 = vrcp.f32 %v558_v26  ;;  %v866_v26 = vrot.slane %v1585_v9, %v865_v25 }
 0x689   :  { %v570_v32 = vpop.permute.xlu1 %569 }
 0x68b   :  { %v572_v31 = vpop.permute.xlu0 %571 }
 0x68c   :  { %1323 = vmatprep.subr.mxu1 %v572_v31 }
 0x68d   :  { %1324 = vmatpush3.msra.mxu1 %v572_v31 }
 0x68e   :  { %1325 = vmatprep.subr.mxu1 %v570_v32 }
 0x68f   :  { %1326 = vmatpush3.msra.mxu1 %v570_v32 }
 0x690   :  { %1330 = vmatprep.subr.mxu1 %v241_v33 }
 0x693   :  { %v1415_v34 = vpop.eup %1414 }
 0x694   :  { %v565_v35 = vmul.f32 %v1415_v34, %v1411_v21 }
 0x695   :  { %v1417_v36 = vpop.eup %1416 }
 0x696   :  { %v563_v37 = vmul.f32 %v1417_v36, %v1413_v23  ;;  %1203 = vst.msk [vmem:[%s1617_s3 + $0x18] sm:$0xff] %vm256_vm8, %v565_v35  ;;  %v951_v23 = vld [vmem:[#allocation2 + $0x98] sm:$0xff] }
 0x697   :  { %1367 = vmatprep.subr.mxu0 %v951_v23 }
 0x698   :  { %1202 = vst.msk [vmem:[%s1617_s3 + $0x10] sm:$0xff] %vm256_vm8, %v563_v37  ;;  %1327 = vmatprep.mubr.msk.f32.mxu1 %vm256_vm8, %v563_v37  ;;  %1368 = vmatpush3.msra.mxu0 %v951_v23  ;;  %v960_v37 = vsub.s32 1, %v1582_v7 }
 0x699   :  { %1328 = vmatmul.mubr.msk.f32.vlgmr.msra.gmra.mxu1 %vm256_vm8, %v565_v35  ;;  %1369 = vmatprep.subr.mxu0 %v950_v24 }
 0x69a   :  { %1331 = vmatpush3.msra.mxu1 %v241_v33  ;;  %1370 = vmatpush3.msra.mxu0 %v950_v24 }
 0x69b   :  { %1332 = vmatprep.subr.mxu1 %v240_v29 }
 0x69c   :  { %1333 = vmatpush3.msra.mxu1 %v240_v29  ;;  %v961_v29 = vrot.slane %v1585_v9, %v960_v37 }
 0x69d   :  { %1344 = vmatprep.subr.mxu1 %v862_v58 }
 0x759   :  { %v1329_v30 = vpop.f32.mrf.mxu1 }
 0x75b   :  { %v647_v38 = vpop.f32.mrf.mxu1 }
 0x75c   :  { %1334 = vmatprep.mubr.msk.f32.mxu1 %vm256_vm8, %v647_v38 }
 0x75d   :  { %1335 = vmatmul.mubr.msk.f32.vlgmr.msra.gmra.mxu1 %vm256_vm8, %v1329_v30 }
 0x75e   :  { %1345 = vmatpush3.msra.mxu1 %v862_v58 }
 0x81d   :  { %v1336_v40 = vpop.f32.mrf.mxu1 }
 0x81e   :  { %v815_v41 = vadd.f32 %v1343_v39, %v1336_v40 }
 0x81f   :  { %v728_v43 = vpop.f32.mrf.mxu1 }
 0x820   :  { %v810_v44 = vadd.f32 %v809_v42, %v728_v43  ;;  %v819_v45 = vadd.f32 %v1499_v27, %v815_v41 }
 0x822   :  { %v823_v46 = vsel %vm154_vm5, %v819_v45, 0.0  ;;  %v818_v47 = vadd.f32 %v810_v44, %v1501_v28  ;;  %v861_v28 = vld [vmem:[#allocation2 + $0x80] sm:$0xff] }
 0x823   :  { %824 = vadd.xlane.f32.xlu0 %v823_v46  ;;  %1346 = vmatprep.subr.mxu1 %v861_v28 }
 0x824   :  { %v820_v48 = vsel %vm154_vm5, %v818_v47, 0.0  ;;  %1347 = vmatpush3.msra.mxu1 %v861_v28 }
 0x825   :  { %821 = vadd.xlane.f32.xlu1 %v820_v48  ;;  %1348 = vmatprep.subr.mxu1 %v860_v59 }
 0x826   :  { %1349 = vmatpush3.msra.mxu1 %v860_v59 }
 0x827   :  { %1350 = vmatprep.subr.mxu1 %v859_v60 }
 0x828   :  { %1351 = vmatpush3.msra.mxu1 %v859_v60 }
 0x8ac   :  { %v825_v49 = vpop.xlane.xlu0 %824 }
 0x8ad   :  { %v828_v50 = vmul.f32 0.03125, %v825_v49 }
 0x8ae   :  { %v822_v51 = vpop.xlane.xlu1 %821 }
 0x8af   :  { %v830_v52 = vsub.f32 %v819_v45, %v828_v50  ;;  %v827_v53 = vmul.f32 0.03125, %v822_v51 }
 0x8b1   :  { %v829_v54 = vsub.f32 %v818_v47, %v827_v53  ;;  %v832_v55 = vmul.f32 %v830_v52, %v830_v52 }
 0x8b3   :  { %v836_v56 = vsel %vm154_vm5, %v832_v55, 0.0  ;;  %v831_v57 = vmul.f32 %v829_v54, %v829_v54  ;;  %v1087_v55 = vld [vmem:[#allocation2 + $0xe8] sm:$0xff] }
 0x8b4   :  { %837 = vadd.xlane.f32.xlu1 %v836_v56  ;;  %v1086_v56 = vld [vmem:[#allocation2 + $0xe0] sm:$0xff]  ;;  %1374 = vmatprep.subr.mxu1 %v1087_v55 }
 0x8b5   :  { %v833_v27 = vsel %vm154_vm5, %v831_v57, 0.0  ;;  %v1085_v57 = vld [vmem:[#allocation2 + $0xd8] sm:$0xff] }
 0x8b6   :  { %834 = vadd.xlane.f32.xlu0 %v833_v27  ;;  %v1084_v27 = vld [vmem:[#allocation2 + $0xd0] sm:$0xff] }
 0x93d   :  { %v838_v1 = vpop.xlane.xlu1 %837 }
 0x93e   :  { %v840_v2 = vmul.f32 0.03125, %v838_v1  ;;  %v1075_v1 = vrot.slane %v1585_v9, %v1074_v63 }
 0x93f   :  { %v835_v3 = vpop.xlane.xlu0 %834 }
 0x940   :  { %v842_v4 = vadd.f32 1e-05, %v840_v2  ;;  %v839_v5 = vmul.f32 0.03125, %v835_v3  ;;  %v1080_v2 = vsub.s32 5, %v1582_v7 }
 0x942   :  { %1418 = vrsqrt.f32 %v842_v4  ;;  %v841_v6 = vadd.f32 1e-05, %v839_v5  ;;  %v1081_v8 = vrot.slane %v1585_v9, %v1080_v2 }
 0x944   :  { %1420 = vrsqrt.f32 %v841_v6 }
 0x94f   :  { %v1419_v10 = vpop.eup %1418 }
 0x950   :  { %v846_v14 = vmul.f32 %v1419_v10, %v830_v52 }
 0x951   :  { %v1421_v15 = vpop.eup %1420 }
 0x952   :  { %v845_v16 = vmul.f32 %v1421_v15, %v829_v54  ;;  %v852_v17 = vmul.f32 %v850_v11, %v846_v14  ;;  %v1090_v14 = vsub.s32 6, %v1582_v7 }
 0x954   :  { %v851_v19 = vmul.f32 %v850_v11, %v845_v16  ;;  %v858_v21 = vadd.f32 %v856_v18, %v852_v17  ;;  %v1091_v15 = vrot.slane %v1585_v9, %v1090_v14 }
 0x956   :  { %v857_v20 = vadd.f32 %v856_v18, %v851_v19 }
 0x958   :  { %1352 = vmatprep.mubr.msk.f32.mxu1 %vm154_vm5, %v857_v20 }
 0x959   :  { %1353 = vmatmul.mubr.msk.f32.vlgmr.msra.gmra.mxu1 %vm154_vm5, %v858_v21 }
 0x95a   :  { %1375 = vmatpush3.msra.mxu1 %v1087_v55 }
 0x95b   :  { %1376 = vmatprep.subr.mxu1 %v1086_v56 }
 0x95c   :  { %1377 = vmatpush3.msra.mxu1 %v1086_v56 }
 0x95d   :  { %1378 = vmatprep.subr.mxu1 %v1085_v57 }
 0x95e   :  { %1379 = vmatpush3.msra.mxu1 %v1085_v57 }
 0x95f   :  { %1380 = vmatprep.subr.mxu1 %v1084_v27 }
 0x960   :  { %1381 = vmatpush3.msra.mxu1 %v1084_v27 }
 0xa19   :  { %v1354_v31 = vpop.f32.mrf.mxu1 }
 0xa1a   :  { %v945_v32 = vadd.f32 %v1354_v31, %v866_v26 }
 0xa1b   :  { %v939_v33 = vpop.f32.mrf.mxu1 }
 0xa1c   :  { %v940_v34 = vadd.f32 %v939_v33, %v866_v26  ;;  %v949_v36 = vmax.f32 %v945_v32, 0.0 }
 0xa1e   :  { %v948_v35 = vmax.f32 %v940_v34, 0.0 }
 0xa20   :  { %1371 = vmatprep.mubr.msk.f32.mxu0 %vm962_vm9, %v948_v35 }
 0xa21   :  { %1372 = vmatmul.mubr.msk.f32.vlgmr.msra.gmra.mxu0 %vm962_vm9, %v949_v36 }
 0xae1   :  { %v1373_v30 = vpop.f32.mrf.mxu0 }
 0xae2   :  { %v1041_v38 = vadd.f32 %v1373_v30, %v961_v29 }
 0xae3   :  { %v1035_v39 = vpop.f32.mrf.mxu0 }
 0xae4   :  { %v1036_v40 = vadd.f32 %v1035_v39, %v961_v29  ;;  %v1045_v41 = vadd.f32 %v1041_v38, %v858_v21 }
 0xae6   :  { %v1049_v42 = vsel %vm154_vm5, %v1045_v41, 0.0  ;;  %v1044_v43 = vadd.f32 %v1036_v40, %v857_v20 }
 0xae7   :  { %1050 = vadd.xlane.f32.xlu1 %v1049_v42 }
 0xae8   :  { %v1046_v44 = vsel %vm154_vm5, %v1044_v43, 0.0 }
 0xae9   :  { %1047 = vadd.xlane.f32.xlu0 %v1046_v44 }
 0xb70   :  { %v1051_v45 = vpop.xlane.xlu1 %1050 }
 0xb71   :  { %v1053_v46 = vmul.f32 0.03125, %v1051_v45 }
 0xb72   :  { %v1048_v47 = vpop.xlane.xlu0 %1047 }
 0xb73   :  { %v1055_v48 = vsub.f32 %v1045_v41, %v1053_v46  ;;  %v1052_v49 = vmul.f32 0.03125, %v1048_v47 }
 0xb75   :  { %v1054_v50 = vsub.f32 %v1044_v43, %v1052_v49  ;;  %v1057_v51 = vmul.f32 %v1055_v48, %v1055_v48 }
 0xb77   :  { %v1061_v52 = vsel %vm154_vm5, %v1057_v51, 0.0  ;;  %v1056_v53 = vmul.f32 %v1054_v50, %v1054_v50 }
 0xb78   :  { %1062 = vadd.xlane.f32.xlu1 %v1061_v52 }
 0xb79   :  { %v1058_v54 = vsel %vm154_vm5, %v1056_v53, 0.0 }
 0xb7a   :  { %1059 = vadd.xlane.f32.xlu0 %v1058_v54 }
 0xc01   :  { %v1063_v58 = vpop.xlane.xlu1 %1062 }
 0xc02   :  { %v1065_v28 = vmul.f32 0.03125, %v1063_v58 }
 0xc03   :  { %v1060_v59 = vpop.xlane.xlu0 %1059 }
 0xc04   :  { %v1067_v60 = vadd.f32 1e-05, %v1065_v28  ;;  %v1064_v61 = vmul.f32 0.03125, %v1060_v59 }
 0xc06   :  { %1422 = vrsqrt.f32 %v1067_v60  ;;  %v1066_v62 = vadd.f32 1e-05, %v1064_v61 }
 0xc08   :  { %1424 = vrsqrt.f32 %v1066_v62 }
 0xc13   :  { %v1423_v0 = vpop.eup %1422 }
 0xc14   :  { %v1071_v3 = vmul.f32 %v1423_v0, %v1055_v48 }
 0xc15   :  { %v1425_v4 = vpop.eup %1424 }
 0xc16   :  { %v1070_v5 = vmul.f32 %v1425_v4, %v1054_v50  ;;  %v1077_v6 = vmul.f32 %v1075_v1, %v1071_v3 }
 0xc18   :  { %v1076_v10 = vmul.f32 %v1075_v1, %v1070_v5  ;;  %v1083_v13 = vadd.f32 %v1081_v8, %v1077_v6 }
 0xc1a   :  { %v1082_v11 = vadd.f32 %v1081_v8, %v1076_v10 }
 0xc1c   :  { %1382 = vmatprep.mubr.msk.f32.mxu1 %vm154_vm5, %v1082_v11 }
 0xc1d   :  { %1383 = vmatmul.mubr.msk.f32.vlgmr.msra.gmra.mxu1 %vm154_vm5, %v1083_v13 }
 0xcdd   :  { %v1384_v16 = vpop.f32.mrf.mxu1 }
 0xcde   :  { %v1170_v17 = vadd.f32 %v1384_v16, %v1091_v15 }
 0xcdf   :  { %v1164_v18 = vpop.f32.mrf.mxu1 }
 0xce0   :  { %1174 = vst [vmem:[%s1616_s2 + $0x8] sm:$0xff] %v1170_v17  ;;  %v1165_v19 = vadd.f32 %v1164_v18, %v1091_v15 }
 0xce2   :  { %1173 = vst [vmem:[%s1616_s2] sm:$0xff] %v1165_v19 }
 0xce3   :  { %1183 = vsyncpa [#allocation3], 1 }

</bundles_post_ra>
